<compile_context>
chip_gen: v5e
topology: v5e:2x2
jax: 0.10.0
libtpu: 0.0.40
codegen_flags: <defaults>
</compile_context>

<pallas_src>
import functools

import jax
import jax.numpy as jnp
from jax import lax
from jax.experimental import pallas as pl
from jax.experimental.pallas import tpu as pltpu

BN_EPS = 1e-5


def _round_up(x, m):
    return ((x + m - 1) // m) * m


# --------------------------------------------------------------------------
# Kernel 1: per-(n, c) sum and sum-of-squares over H*W (tiled reduction).
# Reads compute_dtype, accumulates in f32.  The tiny (N, C) combine is JAX.
# --------------------------------------------------------------------------
def _stats_kernel(x_ref, sum_ref, sq_ref):
    @pl.when(pl.program_id(1) == 0)
    def _init():
        sum_ref[...] = jnp.zeros_like(sum_ref)
        sq_ref[...] = jnp.zeros_like(sq_ref)

    x = x_ref[...].astype(jnp.float32)               # (t_r, t_l)
    sum_ref[...] += jnp.sum(x, axis=1, keepdims=True)
    sq_ref[...] += jnp.sum(x * x, axis=1, keepdims=True)


def channel_sums(x_nchw, *, row_tile=256, col_tile=1024):
    """Returns (sum, sumsq) of shape (N, C), reduced over H*W per (n, c) row."""
    N, C, H, W = x_nchw.shape
    R, L = N * C, H * W
    x2 = x_nchw.reshape(R, L)                        # free view of NCHW

    sub = 8 if x2.dtype.itemsize >= 4 else 16        # bf16 packs 16 rows / vreg
    Rp = _round_up(R, sub)
    t_r = min(Rp, _round_up(row_tile, sub))
    Rp = _round_up(Rp, t_r)
    t_l = min(_round_up(L, 128), _round_up(col_tile, 128))
    Lp = _round_up(L, t_l)
    x2 = jnp.pad(x2, ((0, Rp - R), (0, Lp - L)))     # no-op when already aligned

    sums, sqs = pl.pallas_call(
        _stats_kernel,
        out_shape=(jax.ShapeDtypeStruct((Rp, 1), jnp.float32),
                   jax.ShapeDtypeStruct((Rp, 1), jnp.float32)),
        grid=(Rp // t_r, Lp // t_l),
        in_specs=[pl.BlockSpec((t_r, t_l), lambda r, h: (r, h))],
        out_specs=(pl.BlockSpec((t_r, 1), lambda r, h: (r, 0)),
                   pl.BlockSpec((t_r, 1), lambda r, h: (r, 0))),
        compiler_params=pltpu.CompilerParams(
            dimension_semantics=("parallel", "arbitrary")),
    )(x2)
    return sums[:R, 0].reshape(N, C), sqs[:R, 0].reshape(N, C)


# --------------------------------------------------------------------------
# Kernel 2: conv (stride-1, BN pre-folded) with a manually double-buffered
# halo band and ONE long-contraction MXU matmul per tile, + fused bias + ReLU.
#   x_hbm : (N, C_pad, Lflat)     flattened padded input, stays in HBM (pl.ANY)
#   w_ref : (OC_pad, K*K*C_pad)   folded weights, resident in VMEM
#   b_ref : (OC_pad, 1)           folded bias (f32)
#   o_ref : (1, OC_pad, t_p)      lane-dense output tile (compute dtype)
# --------------------------------------------------------------------------
def _conv_body(x_hbm, w_ref, b_ref, o_ref, band, rhs, sem, *, K, Wp, t_p, band_len):
    n = pl.program_id(0)
    j = pl.program_id(1)
    n_tiles = pl.num_programs(1)
    slot = j % 2
    c_pad = band.shape[1]

    def start_fetch(start, sl):
        pltpu.make_async_copy(
            x_hbm.at[n, :, pl.ds(start, band_len)],
            band.at[sl],
            sem.at[sl],
        ).start()

    # Cold start once per image (prefetch chain is per-n, so "parallel"
    # splitting of the n axis across TensorCores stays correct).
    @pl.when(j == 0)
    def _cold():
        start_fetch(pl.multiple_of(j * t_p, 128), slot)

    # Prefetch the next tile's band into the other slot (issued before the
    # wait so it overlaps with this tile's DMA tail + compute).
    @pl.when(j + 1 < n_tiles)
    def _prefetch():
        start_fetch(pl.multiple_of((j + 1) * t_p, 128), (j + 1) % 2)

    # Wait on this tile's band with the SAME descriptor the producer started
    # (offset j*t_p for both the cold start and the j-1 prefetch).
    pltpu.make_async_copy(
        x_hbm.at[n, :, pl.ds(pl.multiple_of(j * t_p, 128), band_len)],
        band.at[slot],
        sem.at[slot],
    ).wait()

    # Build the (K*K*C_pad, t_p) RHS slab so the conv is a single matmul with
    # a K*K-times longer contraction (keeps the 256-wide MXU fed).
    bslot = band.at[slot]                            # (C_pad, band_len)
    for kh in range(K):
        for kw in range(K):
            kk = kh * K + kw
            rhs[pl.ds(kk * c_pad, c_pad), :] = bslot[:, pl.ds(kh * Wp + kw, t_p)]

    acc = jnp.dot(w_ref[...], rhs[...], preferred_element_type=jnp.float32)
    o_ref[0] = jnp.maximum(acc + b_ref[...], 0.0).astype(o_ref.dtype)


def conv_bias_relu(xf, w2, b2, *, K, Wp, t_p, n_tiles, band_len, out_dtype):
    N, C_pad, _ = xf.shape
    OC_pad, KKC = w2.shape
    L_pad = n_tiles * t_p
    itemsize = jnp.dtype(xf.dtype).itemsize
    out_itemsize = jnp.dtype(out_dtype).itemsize

    kernel = functools.partial(_conv_body, K=K, Wp=Wp, t_p=t_p, band_len=band_len)

    flops = 2 * N * L_pad * KKC * OC_pad
    bytes_accessed = (N * n_tiles * C_pad * band_len * itemsize
                      + w2.size * itemsize + b2.size * 4
                      + N * OC_pad * L_pad * out_itemsize)

    # Actual VMEM need (+ headroom), kept well below v7x's 64 MiB physical VMEM.
    vmem_need = (2 * OC_pad * KKC * itemsize          # weights (double-buffered)
                 + 2 * OC_pad * 4                     # bias
                 + 2 * C_pad * band_len * itemsize    # band double buffer
                 + KKC * t_p * itemsize               # RHS slab scratch
                 + 2 * OC_pad * t_p * out_itemsize)   # output double buffer
    vmem_limit = int(min(2 * vmem_need + (16 << 20), 56 << 20))

    return pl.pallas_call(
        kernel,
        out_shape=jax.ShapeDtypeStruct((N, OC_pad, L_pad), out_dtype),
        grid=(N, n_tiles),
        in_specs=[
            pl.BlockSpec(memory_space=pl.ANY),                    # activation (HBM)
            pl.BlockSpec((OC_pad, KKC), lambda n, j: (0, 0)),     # weights (resident)
            pl.BlockSpec((OC_pad, 1), lambda n, j: (0, 0)),       # bias (resident)
        ],
        out_specs=pl.BlockSpec((1, OC_pad, t_p), lambda n, j: (n, 0, j)),
        scratch_shapes=[
            pltpu.VMEM((2, C_pad, band_len), xf.dtype),   # double-buffered halo band
            pltpu.VMEM((KKC, t_p), xf.dtype),             # RHS slab for merged matmul
            pltpu.SemaphoreType.DMA((2,)),
        ],
        compiler_params=pltpu.CompilerParams(
            dimension_semantics=("parallel", "arbitrary"),
            vmem_limit_bytes=vmem_limit),
        cost_estimate=pl.CostEstimate(flops=flops, transcendentals=0,
                                      bytes_accessed=bytes_accessed),
    )(xf, w2, b2)


# --------------------------------------------------------------------------
# ConvBlock wrapper (BN fold, single fused pad pass, layout plumbing).
# --------------------------------------------------------------------------
class ConvBlockPallas:
    def __init__(self, in_channels, out_channels, ker_size, stride=1,
                 batch_norm_dim=1, padding=0, key=None,
                 compute_dtype=jnp.bfloat16):
        assert batch_norm_dim == in_channels, \
            "batch_norm_dim must equal in_channels for the forward to be valid"
        self.in_channels = in_channels
        self.out_channels = out_channels
        self.k = ker_size
        self.stride = stride
        self.padding = padding
        self.compute_dtype = compute_dtype

        if key is None:
            key = jax.random.PRNGKey(0)
        kw_, kb_ = jax.random.split(key)
        # Deterministic synthetic init (PyTorch shapes: (OC, IC, KH, KW), (OC,)).
        self.conv_w = 0.1 * jax.random.normal(
            kw_, (out_channels, in_channels, ker_size, ker_size), jnp.float32)
        self.conv_b = 0.1 * jax.random.normal(kb_, (out_channels,), jnp.float32)
        # BatchNorm affine params: PyTorch default init.
        self.bn_gamma = jnp.ones((in_channels,), jnp.float32)
        self.bn_beta = jnp.zeros((in_channels,), jnp.float32)

    def __call__(self, x_nchw, *, t_p=1024, stats_col_tile=1024):
        N, C, H, W = x_nchw.shape
        K, S, P = self.k, self.stride, self.padding
        OC = self.out_channels
        cdt = self.compute_dtype
        in_dtype = x_nchw.dtype

        # Cast once; stats, padding and the conv all run in compute_dtype.
        x_c = x_nchw.astype(cdt)

        # ---- batch statistics (tiled Pallas reduction, f32 accumulation) ----
        sums, sqs = channel_sums(x_c, col_tile=stats_col_tile)
        cnt = float(N * H * W)
        mean = jnp.sum(sums, axis=0) / cnt                       # (C,)
        var = jnp.maximum(jnp.sum(sqs, axis=0) / cnt - mean * mean, 0.0)

        # ---- fold BatchNorm into the conv ----
        s = self.bn_gamma * lax.rsqrt(var + BN_EPS)              # (C,)
        t = self.bn_beta - mean * s                              # (C,)
        # TODO(synk): for gamma == 0 with padding > 0 the fold is not exact;
        # guard only prevents inf/NaN (default init gamma=1 is exact).
        s_safe = jnp.where(jnp.abs(s) < 1e-12, 1.0, s)
        pv = jnp.where(jnp.abs(s) < 1e-12, 0.0, -t / s_safe)     # raw value whose BN output is 0

        w_f = self.conv_w * s[None, :, None, None]               # (OC, C, K, K)
        b_f = self.conv_b + jnp.einsum('ocij,c->o', self.conv_w, t)

        # ---- geometry: stride-1 full-padded-width output, flat spatial axis ----
        Hp, Wp = H + 2 * P, W + 2 * P
        OH1 = Hp - K + 1
        OH = (H + 2 * P - K) // S + 1
        OW = (W + 2 * P - K) // S + 1
        L_out = OH1 * Wp                              # flat positions computed by kernel
        t_p = min(_round_up(t_p, 128), _round_up(L_out, 128))
        n_tiles = pl.cdiv(L_out, t_p)
        halo = (K - 1) * Wp + (K - 1)
        band_len = _round_up(t_p + halo, 128)
        Lin_pad = (n_tiles - 1) * t_p + band_len      # max flat index the kernel reads

        C_pad = _round_up(C, 8)
        OC_pad = _round_up(OC, 8)

        # ---- single fused pad pass in compute_dtype ----
        # Zero-pad channels + spatial border + extra tail rows, then overwrite
        # the conv border with the per-channel value whose BN output is 0.
        Hp_ext = max(Hp, -(-Lin_pad // Wp))
        xpad = jnp.pad(x_c, ((0, 0), (0, C_pad - C),
                             (P, P + (Hp_ext - Hp)), (P, P)))
        if P > 0:
            hh = jnp.arange(Hp_ext)[:, None]
            ww = jnp.arange(Wp)[None, :]
            interior = (hh >= P) & (hh < P + H) & (ww >= P) & (ww < P + W)
            pvb = jnp.pad(pv, (0, C_pad - C)).astype(cdt)
            xpad = jnp.where(interior[None, None, :, :], xpad,
                             pvb[None, :, None, None])
        xf = xpad.reshape(N, C_pad, Hp_ext * Wp)                 # flat length >= Lin_pad

        # Folded weights -> (OC_pad, K*K*C_pad) for the single merged matmul.
        w2 = jnp.transpose(w_f, (0, 2, 3, 1))                    # (OC, K, K, C)
        w2 = jnp.pad(w2, ((0, OC_pad - OC), (0, 0), (0, 0), (0, C_pad - C)))
        w2 = w2.reshape(OC_pad, K * K * C_pad).astype(cdt)
        b2 = jnp.pad(b_f, (0, OC_pad - OC)).reshape(OC_pad, 1).astype(jnp.float32)

        y = conv_bias_relu(xf, w2, b2, K=K, Wp=Wp, t_p=t_p, n_tiles=n_tiles,
                           band_len=band_len, out_dtype=cdt)     # (N, OC_pad, L_pad)

        y = y[:, :OC, :L_out].reshape(N, OC, OH1, Wp)
        # TODO(synk): stride>1 subsamples the stride-1 result (wastes ~S^2 work).
        out = y[:, :, 0:(OH - 1) * S + 1:S, 0:(OW - 1) * S + 1:S]
        return out.astype(in_dtype)                              # NCHW

    # Pure-JAX reference (for correctness check only).
    def reference(self, x_nchw):
        x = x_nchw.astype(jnp.float32)
        mean = jnp.mean(x, axis=(0, 2, 3), keepdims=True)
        var = jnp.mean(jnp.square(x - mean), axis=(0, 2, 3), keepdims=True)
        xb = (x - mean) * lax.rsqrt(var + BN_EPS)
        xb = xb * self.bn_gamma.reshape(1, -1, 1, 1) + self.bn_beta.reshape(1, -1, 1, 1)
        y = lax.conv_general_dilated(
            xb, self.conv_w, window_strides=(self.stride, self.stride),
            padding=[(self.padding, self.padding)] * 2,
            dimension_numbers=("NCHW", "OIHW", "NCHW"))
        y = y + self.conv_b.reshape(1, -1, 1, 1)
        return jnp.maximum(y, 0.0)


if __name__ == "__main__":
    key = jax.random.PRNGKey(0)
    kx, kp = jax.random.split(key)

    N, C, H, W = 2, 4, 16, 16
    OC, K, stride, padding = 8, 3, 1, 1

    x = jax.random.normal(kx, (N, C, H, W), jnp.float32)

    # f32-operand path, small tiles: exercises multi-tile pipelining, the
    # double-buffered halo band, the merged-matmul slab and stats accumulation.
    block32 = ConvBlockPallas(C, OC, K, stride=stride, batch_norm_dim=C,
                              padding=padding, key=kp, compute_dtype=jnp.float32)
    ref = jax.block_until_ready(block32.reference(x))

    out32 = jax.block_until_ready(block32(x, t_p=128, stats_col_tile=128))
    assert out32.shape == ref.shape == (N, OC, H, W), (out32.shape, ref.shape)
    err32 = float(jnp.max(jnp.abs(out32 - ref)))
    assert jnp.allclose(out32, ref, atol=5e-4, rtol=5e-4), err32

    # f32 path with default (large) tiles: single-tile / no-prefetch path.
    out32b = jax.block_until_ready(block32(x))
    err32b = float(jnp.max(jnp.abs(out32b - ref)))
    assert jnp.allclose(out32b, ref, atol=5e-4, rtol=5e-4), err32b

    # bf16-operand path (MXU-friendly, f32 accumulation, bf16 output): looser check.
    block16 = ConvBlockPallas(C, OC, K, stride=stride, batch_norm_dim=C,
                              padding=padding, key=kp, compute_dtype=jnp.bfloat16)
    out16 = jax.block_until_ready(block16(x, t_p=128, stats_col_tile=128))
    err16 = float(jnp.max(jnp.abs(out16.astype(jnp.float32) - ref)))
    assert jnp.allclose(out16.astype(jnp.float32), ref, atol=1e-1, rtol=8e-2), err16

    print("KERNEL_OK")
</pallas_src>

<mosaic_0001>
module attributes {stable_mosaic.version = 11 : i64} {
  func.func @_stats_kernel(%arg0: i32, %arg1: i32, %arg2: memref<8x128xf32, #tpu.memory_space<vmem>>, %arg3: memref<8x1xf32, #tpu.memory_space<vmem>>, %arg4: memref<8x1xf32, #tpu.memory_space<vmem>>) attributes {dimension_semantics = [#tpu.dimension_semantics<parallel>, #tpu.dimension_semantics<arbitrary>], iteration_bounds = array<i64: 1, 2>, scalar_prefetch = 0 : i64, scratch_operands = 0 : i64, tpu.core_type = #tpu.core_type<tc>, window_params = [{transform_indices = @transform_0, window_bounds = array<i64: 8, 128>}, {transform_indices = @transform_1, window_bounds = array<i64: 8, 1>}, {transform_indices = @transform_2, window_bounds = array<i64: 8, 1>}]} {
    %c0_i32 = arith.constant 0 : i32
    %0 = arith.cmpi eq, %arg1, %c0_i32 : i32
    %1 = arith.extui %0 : i1 to i32
    %c0_i32_0 = arith.constant 0 : i32
    %2 = arith.cmpi ne, %1, %c0_i32_0 : i32
    scf.if %2 {
      %cst_11 = arith.constant 0.000000e+00 : f32
      %15 = vector.broadcast %cst_11 : f32 to vector<8x1xf32>
      %c0_12 = arith.constant 0 : index
      %c0_13 = arith.constant 0 : index
      %16 = vector.load %arg3[%c0_12, %c0_13] : memref<8x1xf32, #tpu.memory_space<vmem>>, vector<8x1xf32>
      tpu.vector_store %arg3[%c0_12, %c0_13], %15 {strides = array<i32>} : memref<8x1xf32, #tpu.memory_space<vmem>>, vector<8x1xf32>,
      %cst_14 = arith.constant 0.000000e+00 : f32
      %17 = vector.broadcast %cst_14 : f32 to vector<8x1xf32>
      %c0_15 = arith.constant 0 : index
      %c0_16 = arith.constant 0 : index
      %18 = vector.load %arg4[%c0_15, %c0_16] : memref<8x1xf32, #tpu.memory_space<vmem>>, vector<8x1xf32>
      tpu.vector_store %arg4[%c0_15, %c0_16], %17 {strides = array<i32>} : memref<8x1xf32, #tpu.memory_space<vmem>>, vector<8x1xf32>,
    } else {
    }
    %c0 = arith.constant 0 : index
    %c0_1 = arith.constant 0 : index
    %3 = vector.load %arg2[%c0, %c0_1] : memref<8x128xf32, #tpu.memory_space<vmem>>, vector<8x128xf32>
    %c0_2 = arith.constant 0 : index
    %c0_3 = arith.constant 0 : index
    %4 = vector.load %arg3[%c0_2, %c0_3] : memref<8x1xf32, #tpu.memory_space<vmem>>, vector<8x1xf32>
    %cst = arith.constant dense<0.000000e+00> : vector<8xf32>
    %5 = vector.multi_reduction <add>, %3, %cst [1] : vector<8x128xf32> to vector<8xf32>
    %6 = vector.shape_cast %5 : vector<8xf32> to vector<8x1xf32>
    %7 = arith.addf %4, %6 : vector<8x1xf32>
    %c0_4 = arith.constant 0 : index
    %c0_5 = arith.constant 0 : index
    %8 = vector.load %arg3[%c0_4, %c0_5] : memref<8x1xf32, #tpu.memory_space<vmem>>, vector<8x1xf32>
    tpu.vector_store %arg3[%c0_4, %c0_5], %7 {strides = array<i32>} : memref<8x1xf32, #tpu.memory_space<vmem>>, vector<8x1xf32>,
    %c0_6 = arith.constant 0 : index
    %c0_7 = arith.constant 0 : index
    %9 = vector.load %arg4[%c0_6, %c0_7] : memref<8x1xf32, #tpu.memory_space<vmem>>, vector<8x1xf32>
    %10 = arith.mulf %3, %3 : vector<8x128xf32>
    %cst_8 = arith.constant dense<0.000000e+00> : vector<8xf32>
    %11 = vector.multi_reduction <add>, %10, %cst_8 [1] : vector<8x128xf32> to vector<8xf32>
    %12 = vector.shape_cast %11 : vector<8xf32> to vector<8x1xf32>
    %13 = arith.addf %9, %12 : vector<8x1xf32>
    %c0_9 = arith.constant 0 : index
    %c0_10 = arith.constant 0 : index
    %14 = vector.load %arg4[%c0_9, %c0_10] : memref<8x1xf32, #tpu.memory_space<vmem>>, vector<8x1xf32>
    tpu.vector_store %arg4[%c0_9, %c0_10], %13 {strides = array<i32>} : memref<8x1xf32, #tpu.memory_space<vmem>>, vector<8x1xf32>,
    return
  }
  func.func @transform_0(%arg0: i32, %arg1: i32) -> (i32, i32) {
    %c0_i32 = arith.constant 0 : i32
    return %arg0, %arg1 : i32, i32
  }
  func.func @transform_1(%arg0: i32, %arg1: i32) -> (i32, i32) {
    %c0_i32 = arith.constant 0 : i32
    %c0_i32_0 = arith.constant 0 : i32
    return %arg0, %c0_i32 : i32, i32
  }
  func.func @transform_2(%arg0: i32, %arg1: i32) -> (i32, i32) {
    %c0_i32 = arith.constant 0 : i32
    %c0_i32_0 = arith.constant 0 : i32
    return %arg0, %c0_i32 : i32, i32
  }
}

</mosaic_0001>

<bundles_post_ra>
// kernel: tpu_custom_call.1
= control target key start
LH: loop header
LB: loop body
LE: loop exit
PB: predicated region body
PF: predicated region fallthrough
CT: control target
= control target key end

     0   :  { %8 = vsyncpa [#allocation3], 0  ;;  %s576_s0 = inlined_call_operand.hbm [shape: f32[8,256], index: 0, kind: input, shape index: {}]   ;;  %s577_s1 = inlined_call_operand.vmem [shape: f32[8,1], index: 1, kind: output, shape index: {0}]   ;;  %s578_s2 = inlined_call_operand.vmem [shape: f32[8,1], index: 2, kind: output, shape index: {1}]  }
   0x1   :  { %10 = vsyncpa [#allocation3 + $0x1], 0  ;;  %s474_s9 = smov 0   ;;  %s476_s10 = smov 0  }
   0x2   :  { %s478_s11 = smov 0   ;;  %s480_s12 = smov 0  }
   0x3   :  { %s482_s13 = smov 0   ;;  %s484_s14 = smov 0  }
   0x4 LB: > { %s308_s15 = sadd.s32 4294967295, %s456_s14   ;;  %s25_s16 = sadd.s32 1, %s452_s13  ;;  %s456_s14 = sphi %s484_s14, %s16_s14   ;;  %s452_s13 = sphi %s482_s13, %s585_s13   ;;  %s448_s12 = sphi %s480_s12, %s584_s12   ;;  %s444_s11 = sphi %s478_s11, %s583_s11   ;;  %s440_s10 = sphi %s476_s10, %s582_s10   ;;  %s436_s9 = sphi %s474_s9, %s581_s9  }
   0x5   : > { %p26_p0 = scmp.ge.s32.totalorder %s25_s16, 2  ;;  %s37_s17 = sadd.s32 1, %s444_s11 }
   0x6   : > { %p44_p1 = scmp.ne.s32.totalorder %s444_s11, %s440_s10  ;;  %p45_p2 = scmp.eq.s32.totalorder %s456_s14, 0 }
   0x7   : > { %s587_s16 = smov (%p26_p0, %s25_s16), 0  ;;  %p50_p4 = scmp.ne.s32.totalorder %s440_s10, %s436_s9 }
   0x8   : > { %p510_p3 = por %p45_p2, %p44_p1  ;;  %s33_s19 = ssub.s32 %s452_s13, %s587_s16 }
   0x9   : > { %p51_p5 = scmp.eq.s32.totalorder %s308_s15, 0  ;;  %p35_p6 = scmp.eq.s32.totalorder %s33_s19, 0 }
   0xa   : > { %p326_p8 = scmp.lt.s32.totalorder %s456_s14, 2  ;;  %s126_s22 = sand.u32 1, %s444_s11  }
   0xb   : > { %p517_p7 = por %p51_p5, %p50_p4  ;;  %s312_s23 = sshll.u32 %s452_s13, 3 }
   0xc   : > { %s523_s21 = scalar_select %p35_p6, %s444_s11, %s37_s17  }
   0xd   : > { %s311_s24 = sshll.u32 %s126_s22, 3  ;;  %s136_s27 = scalar_lea.hbm %s576_s0, %s312_s23 }
   0xe   : > { %s138_s28 = sshll.u32 %s136_s27, 4  ;;  %s130_s29 = scalar_lea.vmem [#allocation2], %s311_s24  ;;  %s139_s28 = int_to_ptr.hbm [resolvable:$true] %s138_s28 }
   0xf   : > { %s140_s30 = sshll.u32 %s130_s29, 4  ;;  %p323_p9 = pnand %p326_p8, %p510_p3  ;;  %s141_s30 = int_to_ptr.vmem [resolvable:$true] %s140_s30 }
  0x10   : > { %p313_p10 = scmp.ge.s32.totalorder %s456_s14, 1  ;;  %p145_p11 = scmp.lt.s32.totalorder %s456_s14, 3 }
  0x11   : > { %s127_s3 = scalar_lea.sflag [#allocation3], %s126_s22 }
  0x12   : > { %325 = dma.hbm_to_vmem [thread:$0]  (!%p323_p9), %s139_s28, 128, %s141_s30, %s127_s3  }
  0x13   : > { %p146_p12 = pnand %p313_p10, %p145_p11 }
  0x14   : > { %s151_s4 = sand.u32 (!%p146_p12), 1, %s440_s10  }
  0x15   : > { %149 = sbr.rel (%p146_p12) target bundleno = 165 (0xa5), region = 24  ;;  %s314_s5 = sshll.u32 (!%p146_p12), %s151_s4, 3 }
  0x16   : > { %s152_s6 = scalar_lea.sflag (!%p146_p12), [#allocation3], %s151_s4  ;;  %s155_s7 = scalar_lea.vmem (!%p146_p12), [#allocation2], %s314_s5 }
  0x1a   : > { %431 = dma.done.wait (%p517_p7), %s152_s6, 128  }
  0x1b   : > { %433 = vsyncadd (%p517_p7), %s152_s6, 4294967168  ;;  %p315_p13 = scmp.ne.s32.totalorder %s448_s12, 0 }
  0x1d   : > { %191 = sbr.rel (%p315_p13) target bundleno = 37 (0x25), region = 32 }
  0x22   : > { %vm192_vm0 = vcmask 7168   ;;  %v458_v0 = vmov 0.0  }
  0x23   : > { %193 = vst.msk [vmem:[%s577_s1] sm:$0xff] %vm192_vm0, %v458_v0 }
  0x24   : > { %194 = vst.msk [vmem:[%s578_s2] sm:$0xff] %vm192_vm0, %v458_v0 }
  0x25 PF: > { %v195_v1 = vld [vmem:[%s155_s7] sm:$0xff]  ;;  %vm200_vm1 = vcmask 7168  }
  0x26   : > { %197 = vadd.xlane.f32.xlu0 %v195_v1  ;;  %v203_v2 = vmul.f32 %v195_v1, %v195_v1 }
  0x2a   : > { %v196_v3 = vld [vmem:[%s577_s1] sm:$0xff] }
  0x2b   : > { %v202_v6 = vld [vmem:[%s578_s2] sm:$0xff] }
  0x2e   : > { %204 = vadd.xlane.f32.xlu0 %v203_v2 }
  0x99   : > { %v198_v4 = vpop.xlane.xlu0 %197 }
  0x9a   : > { %v199_v5 = vadd.f32 %v198_v4, %v196_v3 }
  0x9c   : > { %201 = vst.msk [vmem:[%s577_s1] sm:$0xff] %vm200_vm1, %v199_v5 }
  0xa1   : > { %v205_v7 = vpop.xlane.xlu0 %204 }
  0xa2   : > { %v206_v8 = vadd.f32 %v205_v7, %v202_v6 }
  0xa4   : > { %207 = vst.msk [vmem:[%s578_s2] sm:$0xff] %vm200_vm1, %v206_v8 }
  0xa5 PF: > { %s16_s14 = sadd.s32 1, %s456_s14   ;;  %s581_s9 = smov %s440_s10 }
  0xa6   : > { %p13_p0 = scmp.ge.s32.totalorder %s16_s14, 4   ;;  %s582_s10 = smov %s444_s11 }
  0xa7   : > { %s583_s11 = smov %s523_s21  ;;  %s584_s12 = smov %s452_s13 }
  0xa8   : > { %s585_s13 = smov %s587_s16  ;;  %15 = sbr.rel (!%p13_p0) target bundleno = 4 (0x4), region = 80 }
  0xad   :  { %241 = vsyncpa [#allocation3], 1 }
  0xae   :  { %243 = vsyncpa [#allocation3 + $0x1], 1 }

</bundles_post_ra>
